<compile_context>
chip_gen: v7x
topology: tpu7x:2x2x1
jax: 0.10.0
libtpu: 0.0.40
codegen_flags: <defaults>
</compile_context>

<pallas_src>
import numpy as np
import jax
import jax.numpy as jnp
from jax.experimental import pallas as pl
from jax.experimental.pallas import tpu as pltpu


def _ffn_kernel_scratch(x_ref, w1_ref, b1_ref, w2_ref, b2_ref, o_ref, acc_ref):
    # x_ref : (tm, d_model)     w1_ref: (d_model, tf)   b1_ref: (n_ffn_blocks, tf)
    # w2_ref: (tf, d_model)     b2_ref: (1, d_model)
    # o_ref : (tm, d_model)     acc_ref: (tm, d_model) f32 scratch
    j = pl.program_id(1)

    @pl.when(j == 0)
    def _init():
        # Seed the accumulator with b2 so no extra (tm, d_model) add at finalize.
        acc_ref[...] = jnp.broadcast_to(b2_ref[...].astype(jnp.float32),
                                        acc_ref.shape)

    # First linear on the current d_ffn slab (MXU, f32 accumulation).
    h = jnp.dot(x_ref[...], w1_ref[...], preferred_element_type=jnp.float32)
    # Bias + ReLU stay in f32 (b1 is resident; row j holds this slab's bias).
    h = jnp.maximum(h + b1_ref[pl.ds(j, 1), :].astype(jnp.float32), 0.0)
    # Second linear slab, accumulated into the f32 VMEM accumulator.
    acc_ref[...] += jnp.dot(h.astype(w2_ref.dtype), w2_ref[...],
                            preferred_element_type=jnp.float32)

    @pl.when(j == pl.num_programs(1) - 1)
    def _finalize():
        o_ref[...] = acc_ref[...].astype(o_ref.dtype)


def _ffn_kernel_inplace(x_ref, w1_ref, b1_ref, w2_ref, b2_ref, o_ref):
    # f32-output variant: accumulate directly into the resident output block
    # (output BlockSpec returns the same block for every j), freeing the
    # tm*d_model*4 B scratch (matters most on v7x's 64 MiB VMEM).
    j = pl.program_id(1)

    @pl.when(j == 0)
    def _init():
        o_ref[...] = jnp.broadcast_to(b2_ref[...].astype(o_ref.dtype),
                                      o_ref.shape)

    h = jnp.dot(x_ref[...], w1_ref[...], preferred_element_type=jnp.float32)
    h = jnp.maximum(h + b1_ref[pl.ds(j, 1), :].astype(jnp.float32), 0.0)
    o_ref[...] += jnp.dot(h.astype(w2_ref.dtype), w2_ref[...],
                          preferred_element_type=jnp.float32)


def _tile_candidates(total, desired, aligns):
    """Divisors of `total` that are multiples of one of `aligns` (tried in
    order of preference) and <= desired, descending.  Falls back to [total]
    (the full extent is always a legal block shape)."""
    hi = max(1, min(total, desired))
    for a in aligns:
        cands = [t for t in range(a, hi + 1, a) if total % t == 0]
        if cands:
            return sorted(set(cands), reverse=True)
    return [total]


def _tpu_config():
    """Returns (generation, vmem_limit_bytes, mxu_align, default_row_tile)."""
    gen = 6
    try:
        kind = jax.devices()[0].device_kind.lower()
        for g in (7, 6, 5, 4):
            if "v%d" % g in kind:
                gen = g
                break
    except Exception:
        pass
    try:
        cap = int(pltpu.get_tpu_info().vmem_capacity_bytes)
    except Exception:
        cap = (64 << 20) if gen >= 7 else (128 << 20)

    if gen >= 7:
        # 64 MiB physical per TC; leave headroom for compiler-internal scratch.
        vmem_limit = max(32 << 20, min(cap, 64 << 20) - (8 << 20))
        mxu_align, default_row_tile = 256, 512
    elif gen <= 5:
        # 128 MiB physical; 128-wide MXU.
        vmem_limit = min(max(cap, 64 << 20), 100 << 20)
        mxu_align, default_row_tile = 128, 256
    else:  # v6e: 128 MiB physical; 256-wide MXU; needs large row tiles.
        vmem_limit = min(max(cap, 64 << 20), 100 << 20)
        mxu_align, default_row_tile = 256, 768
    return gen, int(vmem_limit), mxu_align, default_row_tile


def _vmem_bytes(tm, tf, d_model, d_ffn, cdt_size, out_size, use_scratch):
    """Rough VMEM footprint of one pipeline configuration."""
    n = 2 * (tm * d_model * cdt_size      # X tile (double-buffered)
             + d_model * tf * cdt_size    # W1 slab
             + tf * d_model * cdt_size    # W2 slab
             + tm * d_model * out_size    # output tile
             + d_ffn * 4 + d_model * 4)   # resident biases (tiny)
    n += tm * tf * 6                      # f32 intermediate h + its cast copy
    if use_scratch:
        n += tm * d_model * 4             # f32 accumulator scratch
    return n


def feed_forward(x, w1, b1, w2, b2, *, row_tile=None, ffn_tile=512,
                 compute_dtype=jnp.bfloat16):
    """x: (batch, seq, d_model) -> (batch, seq, d_model).

    compute_dtype (default bf16) is the MXU operand dtype for X/W1/W2;
    accumulation and bias/ReLU stay in f32, output keeps x.dtype.
    row_tile=None picks a generation-dependent default.
    """
    batch, seq, d_model = x.shape
    d_ffn = w1.shape[1]
    assert w1.shape == (d_model, d_ffn)
    assert w2.shape == (d_ffn, d_model)
    assert b1.shape == (d_ffn,) and b2.shape == (d_model,)
    M = batch * seq

    out_dtype = x.dtype
    cdt = np.dtype(compute_dtype)
    out_size = np.dtype(out_dtype).itemsize

    gen, vmem_limit, mxu_align, default_row_tile = _tpu_config()
    if row_tile is None:
        row_tile = default_row_tile
    tile_budget = max(vmem_limit - (4 << 20), 16 << 20)

    # Sublane granularity for the second-to-last dim of the X tile.
    sublane = {4: 8, 2: 16, 1: 32}.get(cdt.itemsize, 8)

    tm_cands = _tile_candidates(M, row_tile, (mxu_align, sublane, 8))
    tf_cands = _tile_candidates(d_ffn, ffn_tile, (max(mxu_align, 128), 128))

    # v7x has 2 TensorCores: make sure the "parallel" row axis has >= 2 steps.
    if gen >= 7:
        multi = [t for t in tm_cands if M // t >= 2]
        if multi:
            tm_cands = multi

    use_scratch = np.dtype(out_dtype) != np.dtype(jnp.float32)

    # Largest (tm, tf) combination (row tile has priority) that fits the budget.
    tm, tf = tm_cands[-1], tf_cands[-1]
    found = False
    for tm_c in tm_cands:
        for tf_c in tf_cands:
            if _vmem_bytes(tm_c, tf_c, d_model, d_ffn, cdt.itemsize,
                           out_size, use_scratch) <= tile_budget:
                tm, tf = tm_c, tf_c
                found = True
                break
        if found:
            break
    # TODO(synk): if even the smallest (tm, tf) exceeds the budget (very large
    # d_model), add an output-column grid axis so the accumulator is tiled too.

    grid = (M // tm, d_ffn // tf)            # rows first, reduction (d_ffn) last
    n_ffn_blocks = grid[1]

    x2d = x.reshape(M, d_model).astype(cdt)
    w1c = w1.astype(cdt)
    w2c = w2.astype(cdt)
    # b1 resident in VMEM: row j holds the bias slab for d_ffn block j.
    b1_blocks = b1.reshape(n_ffn_blocks, tf).astype(jnp.float32)
    b2_2d = b2.reshape(1, d_model).astype(jnp.float32)

    cost = pl.CostEstimate(
        flops=4 * M * d_model * d_ffn,                 # two matmuls
        transcendentals=0,
        bytes_accessed=(M * d_model * (cdt.itemsize + out_size)
                        + grid[0] * 2 * d_model * d_ffn * cdt.itemsize
                        + 4 * (d_ffn + d_model)),
    )

    kernel = _ffn_kernel_scratch if use_scratch else _ffn_kernel_inplace
    scratch_shapes = ([pltpu.VMEM((tm, d_model), jnp.float32)]
                      if use_scratch else [])

    out2d = pl.pallas_call(
        kernel,
        out_shape=jax.ShapeDtypeStruct((M, d_model), out_dtype),
        grid_spec=pltpu.PrefetchScalarGridSpec(
            num_scalar_prefetch=0,
            grid=grid,
            in_specs=[
                pl.BlockSpec((tm, d_model), lambda i, j: (i, 0)),        # X row tile
                pl.BlockSpec((d_model, tf), lambda i, j: (0, j)),        # W1 slab
                pl.BlockSpec((n_ffn_blocks, tf), lambda i, j: (0, 0)),   # b1 (resident)
                pl.BlockSpec((tf, d_model), lambda i, j: (j, 0)),        # W2 slab
                pl.BlockSpec((1, d_model),  lambda i, j: (0, 0)),        # b2 (resident)
            ],
            out_specs=pl.BlockSpec((tm, d_model), lambda i, j: (i, 0)),  # accumulator pattern
            scratch_shapes=scratch_shapes,
        ),
        compiler_params=pltpu.CompilerParams(
            dimension_semantics=("parallel", "arbitrary"),
            vmem_limit_bytes=vmem_limit,
        ),
        cost_estimate=cost,
    )(x2d, w1c, b1_blocks, w2c, b2_2d)

    return out2d.reshape(batch, seq, d_model)


if __name__ == "__main__":
    # Small shapes consistent with (batch, seq, d_model) -> FFN -> d_model.
    batch, seq, d_model, d_ffn = 2, 64, 128, 512

    key = jax.random.PRNGKey(0)
    k_x, k_w1, k_b1, k_w2, k_b2 = jax.random.split(key, 5)

    x = jax.random.normal(k_x, (batch, seq, d_model), dtype=jnp.float32)
    # Parameters stored transposed relative to nn.Linear weights.
    w1 = jax.random.normal(k_w1, (d_model, d_ffn), dtype=jnp.float32) * 0.02
    b1 = jax.random.normal(k_b1, (d_ffn,), dtype=jnp.float32) * 0.02
    w2 = jax.random.normal(k_w2, (d_ffn, d_model), dtype=jnp.float32) * 0.02
    b2 = jax.random.normal(k_b2, (d_model,), dtype=jnp.float32) * 0.02

    # Pure-JAX reference (same semantics as the PyTorch module).
    ref = jnp.maximum(x @ w1 + b1, 0.0) @ w2 + b2

    # Default path (bf16 MXU operands, f32 accumulation); small forced tiles so
    # both grid axes have >1 step (exercises pipelining + accumulation).
    out = feed_forward(x, w1, b1, w2, b2, row_tile=64, ffn_tile=256)
    out = jax.block_until_ready(out)
    assert out.shape == (batch, seq, d_model)
    assert jnp.allclose(out, ref, atol=2e-2, rtol=5e-2)

    # f32 compute path (tight tolerance).
    out_f32 = feed_forward(x, w1, b1, w2, b2, row_tile=64, ffn_tile=256,
                           compute_dtype=jnp.float32)
    out_f32 = jax.block_until_ready(out_f32)
    assert jnp.allclose(out_f32, ref, atol=2e-4, rtol=2e-4)

    # bf16-output path (exercises the scratch-accumulator kernel variant).
    out_bf16 = feed_forward(x.astype(jnp.bfloat16), w1, b1, w2, b2,
                            row_tile=64, ffn_tile=256)
    out_bf16 = jax.block_until_ready(out_bf16)
    assert out_bf16.dtype == jnp.bfloat16
    assert jnp.allclose(out_bf16.astype(jnp.float32), ref, atol=3e-2, rtol=5e-2)

    # Generation-default tiles (largest legal row tile for this device).
    out_def = feed_forward(x, w1, b1, w2, b2)
    out_def = jax.block_until_ready(out_def)
    assert jnp.allclose(out_def, ref, atol=2e-2, rtol=5e-2)

    print("KERNEL_OK")
</pallas_src>

<mosaic_0001>
module attributes {stable_mosaic.version = 11 : i64} {
  func.func @_ffn_kernel_inplace(%arg0: i32, %arg1: i32, %arg2: memref<64x128xbf16, #tpu.memory_space<vmem>>, %arg3: memref<128x256xbf16, #tpu.memory_space<vmem>>, %arg4: memref<2x256xf32, #tpu.memory_space<vmem>>, %arg5: memref<256x128xbf16, #tpu.memory_space<vmem>>, %arg6: memref<1x128xf32, #tpu.memory_space<vmem>>, %arg7: memref<64x128xf32, #tpu.memory_space<vmem>>) attributes {dimension_semantics = [#tpu.dimension_semantics<parallel>, #tpu.dimension_semantics<arbitrary>], iteration_bounds = array<i64: 2, 2>, scalar_prefetch = 0 : i64, scratch_operands = 0 : i64, tpu.core_type = #tpu.core_type<tc>, window_params = [{transform_indices = @transform_0, window_bounds = array<i64: 64, 128>}, {transform_indices = @transform_1, window_bounds = array<i64: 128, 256>}, {pipeline_mode = #tpu.pipeline_mode<synchronous>, transform_indices = @transform_2, window_bounds = array<i64: 2, 256>}, {transform_indices = @transform_3, window_bounds = array<i64: 256, 128>}, {pipeline_mode = #tpu.pipeline_mode<synchronous>, transform_indices = @transform_4, window_bounds = array<i64: 1, 128>}, {transform_indices = @transform_5, window_bounds = array<i64: 64, 128>}]} {
    %c0_i32 = arith.constant 0 : i32
    %0 = arith.cmpi eq, %arg1, %c0_i32 : i32
    %1 = arith.extui %0 : i1 to i32
    %c0_i32_0 = arith.constant 0 : i32
    %2 = arith.cmpi ne, %1, %c0_i32_0 : i32
    scf.if %2 {
      %c0_13 = arith.constant 0 : index
      %c0_14 = arith.constant 0 : index
      %18 = vector.load %arg6[%c0_13, %c0_14] : memref<1x128xf32, #tpu.memory_space<vmem>>, vector<1x128xf32>
      %19 = vector.shape_cast %18 : vector<1x128xf32> to vector<1x128xf32>
      %20 = vector.broadcast %19 : vector<1x128xf32> to vector<64x128xf32>
      %c0_15 = arith.constant 0 : index
      %c0_16 = arith.constant 0 : index
      %21 = vector.load %arg7[%c0_15, %c0_16] : memref<64x128xf32, #tpu.memory_space<vmem>>, vector<64x128xf32>
      tpu.vector_store %arg7[%c0_15, %c0_16], %20 {strides = array<i32>} : memref<64x128xf32, #tpu.memory_space<vmem>>, vector<64x128xf32>,
    } else {
    }
    %c0 = arith.constant 0 : index
    %c0_1 = arith.constant 0 : index
    %3 = vector.load %arg2[%c0, %c0_1] : memref<64x128xbf16, #tpu.memory_space<vmem>>, vector<64x128xbf16>
    %c0_2 = arith.constant 0 : index
    %c0_3 = arith.constant 0 : index
    %4 = vector.load %arg3[%c0_2, %c0_3] : memref<128x256xbf16, #tpu.memory_space<vmem>>, vector<128x256xbf16>
    %cst = arith.constant dense<0.000000e+00> : vector<64x256xf32>
    %5 = tpu.matmul %3, %4, %cst {dimension_numbers = #tpu.dot_dimension_numbers<[1], [0], [0], [1], [0, 0, 1, 1], [], []>} : vector<64x128xbf16>, vector<128x256xbf16>, vector<64x256xf32> -> vector<64x256xf32>
    %6 = arith.index_cast %arg1 : i32 to index
    %c0_4 = arith.constant 0 : index
    %7 = vector.load %arg4[%6, %c0_4] : memref<2x256xf32, #tpu.memory_space<vmem>>, vector<1x256xf32>
    %8 = vector.broadcast %7 : vector<1x256xf32> to vector<64x256xf32>
    %9 = arith.addf %5, %8 : vector<64x256xf32>
    %cst_5 = arith.constant 0.000000e+00 : f32
    %10 = vector.broadcast %cst_5 : f32 to vector<64x256xf32>
    %11 = arith.maximumf %9, %10 : vector<64x256xf32>
    %c0_6 = arith.constant 0 : index
    %c0_7 = arith.constant 0 : index
    %12 = vector.load %arg7[%c0_6, %c0_7] : memref<64x128xf32, #tpu.memory_space<vmem>>, vector<64x128xf32>
    %13 = arith.truncf %11 : vector<64x256xf32> to vector<64x256xbf16>
    %c0_8 = arith.constant 0 : index
    %c0_9 = arith.constant 0 : index
    %14 = vector.load %arg5[%c0_8, %c0_9] : memref<256x128xbf16, #tpu.memory_space<vmem>>, vector<256x128xbf16>
    %cst_10 = arith.constant dense<0.000000e+00> : vector<64x128xf32>
    %15 = tpu.matmul %13, %14, %cst_10 {dimension_numbers = #tpu.dot_dimension_numbers<[1], [0], [0], [1], [0, 0, 1, 1], [], []>} : vector<64x256xbf16>, vector<256x128xbf16>, vector<64x128xf32> -> vector<64x128xf32>
    %16 = arith.addf %12, %15 : vector<64x128xf32>
    %c0_11 = arith.constant 0 : index
    %c0_12 = arith.constant 0 : index
    %17 = vector.load %arg7[%c0_11, %c0_12] : memref<64x128xf32, #tpu.memory_space<vmem>>, vector<64x128xf32>
    tpu.vector_store %arg7[%c0_11, %c0_12], %16 {strides = array<i32>} : memref<64x128xf32, #tpu.memory_space<vmem>>, vector<64x128xf32>,
    return
  }
  func.func @transform_0(%arg0: i32, %arg1: i32) -> (i32, i32) {
    %c0_i32 = arith.constant 0 : i32
    %c0_i32_0 = arith.constant 0 : i32
    return %arg0, %c0_i32 : i32, i32
  }
  func.func @transform_1(%arg0: i32, %arg1: i32) -> (i32, i32) {
    %c0_i32 = arith.constant 0 : i32
    %c0_i32_0 = arith.constant 0 : i32
    return %c0_i32, %arg1 : i32, i32
  }
  func.func @transform_2(%arg0: i32, %arg1: i32) -> (i32, i32) {
    %c0_i32 = arith.constant 0 : i32
    %c0_i32_0 = arith.constant 0 : i32
    %c0_i32_1 = arith.constant 0 : i32
    return %c0_i32, %c0_i32_0 : i32, i32
  }
  func.func @transform_3(%arg0: i32, %arg1: i32) -> (i32, i32) {
    %c0_i32 = arith.constant 0 : i32
    %c0_i32_0 = arith.constant 0 : i32
    return %arg1, %c0_i32 : i32, i32
  }
  func.func @transform_4(%arg0: i32, %arg1: i32) -> (i32, i32) {
    %c0_i32 = arith.constant 0 : i32
    %c0_i32_0 = arith.constant 0 : i32
    %c0_i32_1 = arith.constant 0 : i32
    return %c0_i32, %c0_i32_0 : i32, i32
  }
  func.func @transform_5(%arg0: i32, %arg1: i32) -> (i32, i32) {
    %c0_i32 = arith.constant 0 : i32
    %c0_i32_0 = arith.constant 0 : i32
    return %arg0, %c0_i32 : i32, i32
  }
}

</mosaic_0001>

<bundles_post_ra>
// kernel: tpu_custom_call.1
= control target key start
LH: loop header
LB: loop body
LE: loop exit
PB: predicated region body
PF: predicated region fallthrough
CT: control target
= control target key end

     0   :  { %s2134_s0 = inlined_call_operand.hbm [shape: bf16[128,128], index: 0, kind: input, shape index: {}]   ;;  %s2135_s1 = inlined_call_operand.hbm [shape: bf16[128,512], index: 1, kind: input, shape index: {}]   ;;  %s2136_s2 = inlined_call_operand.hbm [shape: f32[2,256], index: 2, kind: input, shape index: {}]   ;;  %s2137_s3 = inlined_call_operand.hbm [shape: bf16[512,128], index: 3, kind: input, shape index: {}]   ;;  %s2138_s4 = inlined_call_operand.hbm [shape: f32[1,128], index: 4, kind: input, shape index: {}]   ;;  %s2139_s5 = inlined_call_operand.hbm [shape: f32[128,128], index: 5, kind: output, shape index: {}]  }
   0x1   :  { %2156 = sst [smem:[#allocation25_spill]] %s2134_s0 }
   0x2   :  { %2157 = sst [smem:[#allocation26_spill]] %s2135_s1 }
   0x3   :  { %2158 = sst [smem:[#allocation27_spill]] %s2136_s2 }
   0x4   :  { %2159 = sst [smem:[#allocation28_spill]] %s2138_s4 }
   0x5   :  { %2160 = sst [smem:[#allocation29_spill]] %s2139_s5 }
   0x6   :  { %10 = vsyncpa [#allocation3], 0 }
   0x7   :  { %12 = vsyncpa [#allocation3 + $0x1], 0 }
   0x8   :  { %13 = vsyncpa [#allocation6], 0 }
   0x9   :  { %15 = vsyncpa [#allocation6 + $0x1], 0 }
   0xa   :  { %16 = vsyncpa [#allocation9], 0 }
   0xb   :  { %18 = vsyncpa [#allocation9 + $0x1], 0 }
   0xc   :  { %19 = vsyncpa [#allocation4], 0 }
   0xd   :  { %21 = vsyncpa [#allocation4 + $0x1], 0  ;;  %s1637_s18 = smov 0   ;;  %s1639_s19 = smov 0  }
   0xe   :  { %s1641_s20 = smov 0   ;;  %s1643_s21 = smov 0  }
   0xf   :  { %s1645_s22 = smov 0   ;;  %s1647_s23 = smov 0  }
  0x10   :  { %s1649_s24 = smov 0   ;;  %s1651_s25 = smov 0  }
  0x11   :  { %s1653_s26 = smov 0   ;;  %s1655_s27 = smov 0  }
  0x12   :  { %s1657_s28 = smov 0  }
  0x13 LB: > { %2161 = sst [smem:[#allocation18_spill]] %s1563_s21  ;;  %s1691_s29 = sadd.s32 4294967295, %s1591_s28   ;;  %s1591_s28 = sphi %s1657_s28, %s27_s28   ;;  %s1587_s27 = sphi %s1655_s27, %s2204_s27   ;;  %s1583_s26 = sphi %s1653_s26, %s2212_s26   ;;  %s1579_s25 = sphi %s1651_s25, %s2202_s25   ;;  %s1575_s24 = sphi %s1649_s24, %s2211_s24   ;;  %s1571_s23 = sphi %s1647_s23, %s2210_s23   ;;  %s1567_s22 = sphi %s1645_s22, %s2209_s22   ;;  %s1563_s21 = sphi %s1643_s21, %s2208_s21   ;;  %s1559_s20 = sphi %s1641_s20, %s2207_s20   ;;  %s1555_s19 = sphi %s1639_s19, %s2206_s19   ;;  %s1551_s18 = sphi %s1637_s18, %s2205_s18  }
  0x14   : > { %2162 = sst [smem:[#allocation19_spill]] %s1579_s25  ;;  %s1011_s30 = sadd.s32 4294967294, %s1591_s28  }
  0x15   : > { %2163 = sst [smem:[#allocation20_spill]] %s1587_s27  ;;  %p2143_p0 = scmp.eq.s32.totalorder %s1591_s28, 0 }
  0x16   : > { %p59_p1 = scmp.ne.s32.totalorder %s1567_s22, %s1563_s21  ;;  %p2141_p2 = scmp.eq.s32.totalorder %s1691_s29, 0 }
  0x17   : > { %p79_p3 = scmp.ne.s32.totalorder %s1559_s20, %s1555_s19  ;;  %p85_p4 = scmp.ne.s32.totalorder %s1555_s19, %s1551_s18 }
  0x18   : > { %p1704_p5 = por %p2141_p2, %p59_p1  ;;  %p183_p9 = scmp.eq.s32.totalorder %s1011_s30, 3 }
  0x19   : > { %p1711_p7 = por %p79_p3, %p2143_p0  ;;  %p1717_p8 = por %p85_p4, %p2141_p2 }
  0x1a   : > { %s2164_s7 = scalar_select %p1704_p5, 1, 0 }
  0x1b   : > { %s2165_s8 = scalar_select %p1711_p7, 1, 0 }
  0x1c   : > { %s2166_s9 = scalar_select %p1717_p8, 1, 0 }
  0x1d   : > { %p1012_p10 = scmp.ge.s32.totalorder %s1591_s28, 1  ;;  %p190_p11 = scmp.lt.s32.totalorder %s1591_s28, 5 }
  0x1e   : > { %p1723_p12 = por %p183_p9, %p59_p1  ;;  %s1593_s12 = smov [#allocation7]  }
  0x1f   : > { %p1727_p13 = pnand %p1012_p10, %p190_p11  ;;  %s203_s13 = sshll.u32 %s1593_s12, 4  ;;  %s204_s13 = int_to_ptr.vmem [resolvable:$true] %s203_s13 }
  0x20   : > { %s2167_s10 = scalar_select %p1723_p12, 1, 0 }
  0x21   : > { %s2169_s11 = scalar_select %p1727_p13, 1, 0 }
  0x22   : > { %2168 = sst [smem:[#allocation21_spill]] %s2167_s10  ;;  %p1138_p3 = pneg %p1727_p13 }
  0x23   : > { %s1594_s14 = smov [#allocation10]   ;;  %s2171_s2 = sld [smem:[#allocation27_spill]] }
  0x24   : > { %s214_s15 = sshll.u32 %s1594_s14, 4  ;;  %p1735_p4 = pnand %p1138_p3, %p2141_p2  ;;  %s1739_s15 = int_to_ptr.vmem [resolvable:$true] %s214_s15 }
  0x26   : > { %p1309_p9 = pneg %p1735_p4 }
  0x29   : > { %s1307_s30 = scalar_lea.hbm %s2171_s2, 64 }
  0x2a   : > { %p1308_p1 = scmp.ne.s32.totalorder %s2171_s2, %s1307_s30  ;;  %p1314_p3 = scmp.lt.u32.totalorder %s1307_s30, %s2171_s2 }
  0x2c   : > { %p1310_p10 = pnand %p1309_p9, %p1308_p1 }
  0x2e   : > { %p1311_p11 = pneg %p1310_p10 }
  0x30   : > { %p1316_p2 = pnand %p1314_p3, %p1311_p11 }
  0x32   : > { %1319 = shalt.err (!%p1316_p2)
}
  0x33   : > { %s1320_s21 = scalar_lea.vmem %s204_s13, 64  ;;  %p1328_p8 = scmp.lt.s32.totalorder %s204_s13, %s204_s13 }
  0x34   : > { %p1321_p6 = scmp.ne.s32.totalorder %s204_s13, %s1320_s21  ;;  %p1329_p5 = scmp.lt.s32.totalorder %s1320_s21, %s1320_s21 }
  0x36   : > { %p1323_p0 = pnand %p1321_p6, %p1309_p9  ;;  %p1330_p13 = por %p1329_p5, %p1328_p8 }
  0x38   : > { %p1324_p12 = pneg %p1323_p0 }
  0x3a   : > { %p1331_p7 = pnand %p1330_p13, %p1324_p12 }
  0x3c   : > { %1334 = shalt.err (!%p1331_p7)
}
  0x3d   : > { %1141 = dma.hbm_to_vmem [thread:$0]  (!%p1735_p4), %s2171_s2, 64, %s204_s13, [#allocation6]  }
  0x3e   : > { %s2172_s4 = sld [smem:[#allocation28_spill]] }
  0x44   : > { %s1335_s30 = scalar_lea.hbm %s2172_s4, 16 }
  0x45   : > { %p1336_p0 = scmp.ne.s32.totalorder %s2172_s4, %s1335_s30  ;;  %p1342_p6 = scmp.lt.u32.totalorder %s1335_s30, %s2172_s4 }
  0x47   : > { %p1338_p2 = pnand %p1336_p0, %p1309_p9 }
  0x49   : > { %p1339_p5 = pneg %p1338_p2 }
  0x4b   : > { %p1344_p7 = pnand %p1342_p6, %p1339_p5 }
  0x4d   : > { %1347 = shalt.err (!%p1344_p7)
}
  0x4e   : > { %s1348_s13 = scalar_lea.vmem %s1739_s15, 16  ;;  %s1355_s6 = scalar_lea.vmem %s1739_s15, 32 }
  0x4f   : > { %p1349_p8 = scmp.ne.s32.totalorder %s1739_s15, %s1348_s13  ;;  %p1356_p1 = scmp.lt.s32.totalorder %s1739_s15, %s1739_s15 }
  0x50   : > { %p1357_p10 = scmp.lt.s32.totalorder %s1355_s6, %s1348_s13 }
  0x51   : > { %p1351_p12 = pnand %p1349_p8, %p1309_p9 }
  0x52   : > { %p1358_p11 = por %p1357_p10, %p1356_p1 }
  0x53   : > { %p1352_p13 = pneg %p1351_p12 }
  0x55   : > { %p1359_p3 = pnand %p1358_p11, %p1352_p13 }
  0x57   : > { %1362 = shalt.err (!%p1359_p3)
}
  0x58   : > { %1144 = dma.hbm_to_vmem [thread:$0]  (!%p1735_p4), %s2172_s4, 16, %s1739_s15, [#allocation9]  }
  0x59   : > { %s36_s10 = sadd.s32 1, %s1583_s26  ;;  %s39_s16 = sadd.s32 1, %s1587_s27 }
  0x5a   : > { %p37_p9 = scmp.ge.s32.totalorder %s36_s10, 2  ;;  %s46_s18 = sadd.s32 1, %s1571_s23 }
  0x5b   : > { %p53_p0 = scmp.ne.s32.totalorder %s1571_s23, %s1567_s22  ;;  %p1161_p2 = scmp.lt.s32.totalorder %s1591_s28, 4 }
  0x5c   : > { %s2214_s10 = smov (%p37_p9, %s36_s10), 0  ;;  %s2216_s16 = smov (!%p37_p9, %s39_s16), %s1587_s27 }
  0x5d   : > { %2173 = sst [smem:[#allocation22_spill]] %s2214_s10  ;;  %p2174_p5 = scmp.eq.s32.totalorder %s1591_s28, 0 }
  0x5e   : > { %s69_s15 = ssub.s32 %s1583_s26, %s2214_s10  ;;  %p41_p4 = scmp.ge.s32.totalorder %s2216_s16, 2 }
  0x5f   : > { %p1800_p6 = por %p2174_p5, %p53_p0  ;;  %p70_p7 = scmp.eq.s32.totalorder %s69_s15, 0 }
  0x60   : > { %p2176_p8 = scmp.eq.s32.totalorder %s1691_s29, 3  ;;  %s225_s14 = sand.u32 1, %s1571_s23  }
  0x61   : > { %s2218_s16 = smov (%p41_p4, %s2216_s16), 0  ;;  %s2180_s21 = sadd.s32 1, %s1559_s20 }
  0x62   : > { %p1808_p12 = por %p2176_p8, %p53_p0  ;;  %2179 = sst [smem:[#allocation24_spill]] %s2218_s16 }
  0x63   : > { %s1818_s13 = scalar_select %p70_p7, %s1559_s20, %s2180_s21  }
  0x64   : > { %s2177_s12 = scalar_select %p1808_p12, 1, 0 }
  0x65   : > { %s43_s6 = ssub.s32 %s1587_s27, %s2218_s16  ;;  %s1016_s5 = sshll.u32 %s225_s14, 5 }
  0x66   : > { %2178 = sst [smem:[#allocation23_spill]] %s2177_s12  ;;  %p44_p13 = scmp.eq.s32.totalorder %s43_s6, 0 }
  0x67   : > { %s1077_s17 = sshll.u32 %s1587_s27, 9  ;;  %s2181_s0 = sld [smem:[#allocation25_spill]] }
  0x68   : > { %s1824_s2 = scalar_select %p44_p13, %s1571_s23, %s46_s18  }
  0x69   : > { %s229_s12 = scalar_lea.vmem [#allocation2], %s1016_s5  ;;  %p1837_p1 = pnand %p1161_p2, %p1800_p6 }
  0x6a   : > { %s236_s25 = sshll.u32 %s229_s12, 4  ;;  %p2183_p10 = scmp.ne.s32.totalorder %s2165_s8, 0  ;;  %s1831_s25 = int_to_ptr.vmem [resolvable:$true] %s236_s25 }
  0x6b   : > { %s1849_s18 = scalar_lea.sflag [#allocation3], %s225_s14  ;;  %p1365_p9 = pneg %p1837_p1 }
  0x6c   : > { %p1845_p11 = pnand %p1161_p2, %p2183_p10 }
  0x6d   : > { %s1829_s10 = scalar_lea.hbm %s2181_s0, %s1077_s17  ;;  %s1368_s8 = scalar_lea.hbm %s2181_s0, 1024 }
  0x6e   : > { %s1363_s6 = scalar_lea.hbm %s1829_s10, 512  ;;  %p1369_p2 = scmp.lt.u32.totalorder %s1829_s10, %s2181_s0 }
  0x6f   : > { %p1364_p3 = scmp.ne.s32.totalorder %s1829_s10, %s1363_s6  ;;  %p1370_p6 = scmp.lt.u32.totalorder %s1368_s8, %s1363_s6 }
  0x70   : > { %p1372_p7 = scmp.lt.u32.totalorder %s1363_s6, %s1829_s10 }
  0x71   : > { %p1366_p0 = pnand %p1365_p9, %p1364_p3  ;;  %p1371_p4 = por %p1370_p6, %p1369_p2 }
  0x73   : > { %p1367_p5 = pneg %p1366_p0  ;;  %p1373_p8 = por %p1372_p7, %p1371_p4 }
  0x75   : > { %p1374_p13 = pnand %p1373_p8, %p1367_p5 }
  0x77   : > { %1377 = shalt.err (!%p1374_p13)
}
  0x78   : > { %s1378_s14 = scalar_lea.vmem %s1831_s25, 512  ;;  %s1595_s15 = smov [#allocation2]  }
  0x79   : > { %p1379_p10 = scmp.ne.s32.totalorder %s1831_s25, %s1378_s14  ;;  %s1383_s30 = sshll.u32 %s1595_s15, 4  ;;  %s1384_s30 = int_to_ptr.vmem [resolvable:$false] %s1383_s30 }
  0x7a   : > { %s1385_s12 = scalar_lea.vmem %s1384_s30, 1024  ;;  %p1386_p12 = scmp.lt.s32.totalorder %s1831_s25, %s1384_s30 }
  0x7b   : > { %p1381_p3 = pnand %p1379_p10, %p1365_p9  ;;  %p1387_p2 = scmp.lt.s32.totalorder %s1385_s12, %s1378_s14 }
  0x7d   : > { %p1382_p0 = pneg %p1381_p3  ;;  %p1388_p6 = por %p1387_p2, %p1386_p12 }
  0x7f   : > { %p1389_p4 = pnand %p1388_p6, %p1382_p0 }
  0x81   : > { %1392 = shalt.err (!%p1389_p4)
}
  0x82   : > { %s2153_s6 = smov 64   ;;  %s2154_s8 = smov 4  }
  0x83   : > { %1148 = dma.hbm_to_vmem [thread:$0]  (!%p1837_p1), %s1829_s10, 512, %s1831_s25, %s1849_s18, %s2153_s6, %s2153_s6, %s2154_s8  }
  0x84   : > { %s246_s5 = sand.u32 1, %s1591_s28   ;;  %s248_s17 = sand.u32 1, %s1559_s20  }
  0x85   : > { %s1882_s14 = sshll.u32 %s248_s17, 7  ;;  %s1078_s15 = sshll.u32 %s1583_s26, 7 }
  0x86   : > { %s2185_s1 = sld [smem:[#allocation26_spill]]  ;;  %s250_s21 = scalar_lea.vmem [#allocation5], %s1882_s14 }
  0x87   : > { %s257_s16 = sshll.u32 %s250_s21, 4  ;;  %s1895_s25 = scalar_lea.sflag [#allocation6], %s246_s5  ;;  %s1891_s16 = int_to_ptr.vmem [resolvable:$true] %s257_s16 }
  0x88   : > { %p1395_p1 = pneg %p1845_p11 }
  0x8c   : > { %s1888_s0 = scalar_lea.hbm %s2185_s1, %s1078_s15  ;;  %s1398_s15 = scalar_lea.hbm %s2185_s1, 4096 }
  0x8d   : > { %s1393_s10 = scalar_lea.hbm %s1888_s0, 2048  ;;  %p1399_p7 = scmp.lt.u32.totalorder %s1888_s0, %s2185_s1 }
  0x8e   : > { %p1394_p12 = scmp.ne.s32.totalorder %s1888_s0, %s1393_s10  ;;  %p1400_p8 = scmp.lt.u32.totalorder %s1398_s15, %s1393_s10 }
  0x8f   : > { %p1402_p10 = scmp.lt.u32.totalorder %s1393_s10, %s1888_s0 }
  0x90   : > { %p1396_p9 = pnand %p1395_p1, %p1394_p12  ;;  %p1401_p13 = por %p1400_p8, %p1399_p7 }
  0x92   : > { %p1397_p5 = pneg %p1396_p9  ;;  %p1403_p3 = por %p1402_p10, %p1401_p13 }
  0x94   : > { %p1404_p0 = pnand %p1403_p3, %p1397_p5 }
  0x96   : > { %1407 = shalt.err (!%p1404_p0)
}
  0x97   : > { %s1408_s21 = scalar_lea.vmem %s1891_s16, 2048  ;;  %s1598_s18 = smov [#allocation5]  }
  0x98   : > { %p1409_p2 = scmp.ne.s32.totalorder %s1891_s16, %s1408_s21  ;;  %s1413_s17 = sshll.u32 %s1598_s18, 4  ;;  %s1414_s17 = int_to_ptr.vmem [resolvable:$false] %s1413_s17 }
  0x99   : > { %s1415_s30 = scalar_lea.vmem %s1414_s17, 4096  ;;  %p1416_p12 = scmp.lt.s32.totalorder %s1891_s16, %s1414_s17 }
  0x9a   : > { %p1411_p6 = pnand %p1409_p2, %p1395_p1  ;;  %p1417_p9 = scmp.lt.s32.totalorder %s1415_s30, %s1408_s21 }
  0x9c   : > { %p1412_p4 = pneg %p1411_p6  ;;  %p1418_p7 = por %p1417_p9, %p1416_p12 }
  0x9e   : > { %p1419_p8 = pnand %p1418_p7, %p1412_p4 }
  0xa0   : > { %1422 = shalt.err (!%p1419_p8)
}
  0xa1   : > { %s1599_s10 = smov 256   ;;  %s1600_s15 = smov 128  }
  0xa2   : > { %s1601_s12 = smov 8   ;;  %s1079_s18 = sshll.u32 %s1583_s26, 11 }
  0xa3   : > { %1151 = dma.hbm_to_vmem [thread:$0]  (!%p1845_p11), %s1888_s0, 2048, %s1891_s16, %s1895_s25, %s1599_s10, %s1600_s15, %s1601_s12  }
  0xa4   : > { %s1927_s21 = scalar_lea.hbm %s2137_s3, %s1079_s18  ;;  %s271_s30 = scalar_lea.vmem [#allocation8], %s1882_s14 }
  0xa5   : > { %s278_s8 = sshll.u32 %s271_s30, 4  ;;  %s1934_s1 = scalar_lea.sflag [#allocation9], %s246_s5  ;;  %s1930_s8 = int_to_ptr.vmem [resolvable:$true] %s278_s8 }
  0xa6   : > { %s1423_s27 = scalar_lea.hbm %s1927_s21, 2048  ;;  %s1428_s6 = scalar_lea.hbm %s2137_s3, 4096 }
  0xa7   : > { %p1424_p5 = scmp.ne.s32.totalorder %s1927_s21, %s1423_s27  ;;  %p1429_p3 = scmp.lt.u32.totalorder %s1927_s21, %s2137_s3 }
  0xa8   : > { %p1430_p0 = scmp.lt.u32.totalorder %s1428_s6, %s1423_s27  ;;  %p1432_p6 = scmp.lt.u32.totalorder %s1423_s27, %s1927_s21 }
  0xa9   : > { %p1426_p13 = pnand %p1424_p5, %p1395_p1 }
  0xaa   : > { %p1431_p2 = por %p1430_p0, %p1429_p3 }
  0xab   : > { %p1427_p10 = pneg %p1426_p13 }
  0xac   : > { %p1433_p4 = por %p1432_p6, %p1431_p2 }
  0xae   : > { %p1434_p12 = pnand %p1433_p4, %p1427_p10 }
  0xb0   : > { %1437 = shalt.err (!%p1434_p12)
}
  0xb1   : > { %s1438_s5 = scalar_lea.vmem %s1930_s8, 2048  ;;  %s1602_s14 = smov [#allocation8]  }
  0xb2   : > { %p1439_p9 = scmp.ne.s32.totalorder %s1930_s8, %s1438_s5  ;;  %s1443_s15 = sshll.u32 %s1602_s14, 4  ;;  %s1444_s15 = int_to_ptr.vmem [resolvable:$false] %s1443_s15 }
  0xb3   : > { %s1445_s12 = scalar_lea.vmem %s1444_s15, 4096  ;;  %p1446_p5 = scmp.lt.s32.totalorder %s1930_s8, %s1444_s15 }
  0xb4   : > { %p1441_p7 = pnand %p1439_p9, %p1395_p1  ;;  %p1447_p13 = scmp.lt.s32.totalorder %s1445_s12, %s1438_s5 }
  0xb6   : > { %p1442_p8 = pneg %p1441_p7  ;;  %p1448_p3 = por %p1447_p13, %p1446_p5 }
  0xb8   : > { %p1449_p0 = pnand %p1448_p3, %p1442_p8 }
  0xba   : > { %1452 = shalt.err (!%p1449_p0)
}
  0xbb   : > { %s2186_s27 = smov 4   ;;  %s2187_s18 = smov 64  }
  0xbc   : > { %1154 = dma.hbm_to_vmem [thread:$0]  (!%p1845_p11), %s1927_s21, 2048, %s1930_s8, %s1934_s1, %s2187_s18, %s2187_s18, %s2186_s27  }
  0xbd   : > { %p2188_p1 = scmp.ne.s32.totalorder %s2169_s11, 0 }
  0xbe   : > { %s1966_s17 = sand.u32 (!%p2188_p1), 1, %s1567_s22   ;;  %p2189_p10 = scmp.ne.s32.totalorder (!%p2188_p1), %s2164_s7, 0 }
  0xbf   : > { %290 = sbr.rel (%p2188_p1) target bundleno = 735 (0x2df), region = 40  ;;  %s1026_s30 = sshll.u32 (!%p2188_p1), %s1966_s17, 5 }
  0xc0   : > { %s293_s0 = scalar_lea.sflag (!%p2188_p1), [#allocation3], %s1966_s17  ;;  %s1970_s16 = scalar_lea.vmem (!%p2188_p1), [#allocation2], %s1026_s30 }
  0xc6   : > { %1526 = dma.done.wait (%p2189_p10), %s293_s0, 512  }
  0xc7   : > { %1528 = vsyncadd (%p2189_p10), %s293_s0, 4294966784  ;;  %s301_s1 = sand.u32 1, %s1691_s29   ;;  %s303_s11 = sand.u32 1, %s1555_s19  }
  0xc8   : > { %s1027_s4 = sshll.u32 %s303_s11, 7  ;;  %s302_s8 = scalar_lea.sflag [#allocation6], %s301_s1 }
  0xc9   : > { %s1978_s21 = scalar_lea.vmem [#allocation5], %s1027_s4  ;;  %p2190_p11 = scmp.ne.s32.totalorder %s2166_s9, 0 }
  0xcb   : > { %1530 = dma.done.wait (%p2190_p11), %s302_s8, 2048  }
  0xcc   : > { %1532 = vsyncadd (%p2190_p11), %s302_s8, 4294965248  ;;  %p2191_p2 = scmp.eq.s32.totalorder %s1691_s29, 0 }
  0xce   : > { %1534 = dma.done.wait (%p2191_p2), [#allocation6], 64   ;;  %p2192_p6 = pmov %p2191_p2 }
  0xcf   : > { %s315_s7 = scalar_lea.sflag [#allocation9], %s301_s1  ;;  %s1988_s6 = scalar_lea.vmem [#allocation8], %s1027_s4 }
  0xd0   : > { %1536 = vsyncadd (%p2192_p6), [#allocation6], 4294967232 }
  0xd1   : > { %1538 = dma.done.wait (%p2190_p11), %s315_s7, 2048  }
  0xd2   : > { %1540 = vsyncadd (%p2190_p11), %s315_s7, 4294965248  ;;  %p2193_p4 = pmov %p2191_p2 }
  0xd3   : > { %p2194_p12 = pmov %p2191_p2 }
  0xd4   : > { %1542 = dma.done.wait (%p2193_p4), [#allocation9], 16  }
  0xd5   : > { %1544 = vsyncadd (%p2194_p12), [#allocation9], 4294967280  ;;  %s1031_s25 = sshll.u32 %s1966_s17, 6  ;;  %p1032_p9 = scmp.ne.s32.totalorder %s1575_s24, 0 }
  0xd6   : > { %s1999_s10 = scalar_lea.vmem [#allocation11], %s1031_s25  ;;  %v1033_v0 = vld [vmem:[#allocation10] ss:$0 sm:$0xff] (!%p1032_p9) }
  0xd7   : > { %367 = sbr.rel (%p1032_p9) target bundleno = 222 (0xde), region = 64  ;;  %375 = vst [vmem:[%s1999_s10] sm:$0xff] (!%p1032_p9), %v1033_v0  ;;  %376 = vst [vmem:[%s1999_s10 + $0x8] sm:$0xff] (!%p1032_p9), %v1033_v0 }
  0xd8   : > { %377 = vst [vmem:[%s1999_s10 + $0x10] sm:$0xff] (!%p1032_p9), %v1033_v0  ;;  %378 = vst [vmem:[%s1999_s10 + $0x18] sm:$0xff] (!%p1032_p9), %v1033_v0 }
  0xd9   : > { %379 = vst [vmem:[%s1999_s10 + $0x20] sm:$0xff] (!%p1032_p9), %v1033_v0  ;;  %380 = vst [vmem:[%s1999_s10 + $0x28] sm:$0xff] (!%p1032_p9), %v1033_v0 }
  0xda   : > { %381 = vst [vmem:[%s1999_s10 + $0x30] sm:$0xff] (!%p1032_p9), %v1033_v0  ;;  %382 = vst [vmem:[%s1999_s10 + $0x38] sm:$0xff] (!%p1032_p9), %v1033_v0 }
  0xde PF: > { %v1263_v1 = vld [vmem:[%s1978_s21 + $0x4] ss:$8 sps:$4 sm:$0xff]   ;;  %v1265_v2 = vld [vmem:[%s1978_s21] ss:$8 sps:$4 sm:$0xff]   ;;  %v1603_v3 = vmov 0   ;;  %v1295_v18 = vld [vmem:[%s1988_s6 + $0x50] sm:$0xff]   ;;  %v417_v38 = vlaneseq }
  0xdf   : > { %563 = vmatprep.mubr.bf16.mxu0 %v1603_v3  ;;  %531 = vmatprep.subr.bf16.mxu0 %v1263_v1  ;;  %v1266_v4 = vld [vmem:[%s1978_s21 + $0x14] ss:$8 sps:$4 sm:$0xff]   ;;  %v1268_v5 = vld [vmem:[%s1978_s21 + $0x10] ss:$8 sps:$4 sm:$0xff]   ;;  %v1269_v6 = vld [vmem:[%s1978_s21 + $0x24] ss:$8 sps:$4 sm:$0xff]  }
  0xe0   : > { %532 = vmatpush1.bf16.msra.mxu0 %v1265_v2  ;;  %v1271_v7 = vld [vmem:[%s1978_s21 + $0x20] ss:$8 sps:$4 sm:$0xff]   ;;  %v1272_v8 = vld [vmem:[%s1978_s21 + $0x34] ss:$8 sps:$4 sm:$0xff]   ;;  %v1274_v9 = vld [vmem:[%s1978_s21 + $0x30] ss:$8 sps:$4 sm:$0xff]  }
  0xe1   : > { %533 = vmatprep.subr.bf16.mxu0 %v1266_v4  ;;  %v1275_v10 = vld [vmem:[%s1978_s21 + $0x44] ss:$8 sps:$4 sm:$0xff]   ;;  %v1277_v11 = vld [vmem:[%s1978_s21 + $0x40] ss:$8 sps:$4 sm:$0xff]   ;;  %v1278_v12 = vld [vmem:[%s1978_s21 + $0x54] ss:$8 sps:$4 sm:$0xff]  }
  0xe2   : > { %v1291_v13 = vld [vmem:[%s1988_s6 + $0x40] sm:$0xff]   ;;  %v1280_v15 = vld [vmem:[%s1978_s21 + $0x50] ss:$8 sps:$4 sm:$0xff]   ;;  %v1297_v22 = vld [vmem:[%s1988_s6 + $0x58] sm:$0xff]   ;;  %s407_s29 = sshra.s32 %s1575_s24, 1  ;;  %s410_s9 = sand.u32 1, %s1575_s24 }
  0xe3   : > { %v1292_v14 = vld [vmem:[%s1988_s6] sm:$0xff]   ;;  %1082 = vmatprep.subr.bf16.mxu1 %v1291_v13  ;;  %v1293_v16 = vld [vmem:[%s1988_s6 + $0x48] sm:$0xff]   ;;  %v1296_v21 = vld [vmem:[%s1988_s6 + $0x10] sm:$0xff]   ;;  %s1080_s5 = sshll.u32 %s407_s29, 2  ;;  %v418_v39 = vshrl.u32 %v417_v38, 7  ;;  %s2195_s24 = sld [smem:[#allocation19_spill]] }
  0xe4   : > { %534 = vmatpush1.bf16.msra.mxu0 %v1268_v5  ;;  %1083 = vmatpush3.bf16.msra.mxu1 %v1292_v14  ;;  %v1294_v17 = vld [vmem:[%s1988_s6 + $0x8] sm:$0xff]   ;;  %v1283_v20 = vld [vmem:[%s1978_s21 + $0x60] ss:$8 sps:$4 sm:$0xff]   ;;  %v1284_v23 = vld [vmem:[%s1978_s21 + $0x74] ss:$8 sps:$4 sm:$0xff]   ;;  %s413_s14 = sadd.s32 %s1080_s5, %s410_s9  ;;  %s2196_s12 = sld [smem:[#allocation23_spill]] }
  0xe5   : > { %535 = vmatprep.subr.bf16.mxu0 %v1269_v6  ;;  %1084 = vmatprep.subr.bf16.mxu1 %v1293_v16  ;;  %v1281_v19 = vld [vmem:[%s1978_s21 + $0x64] ss:$8 sps:$4 sm:$0xff]   ;;  %v1286_v24 = vld [vmem:[%s1978_s21 + $0x70] ss:$8 sps:$4 sm:$0xff]   ;;  %v1298_v25 = vld [vmem:[%s1988_s6 + $0x18] sm:$0xff]   ;;  %v419_v40 = vsub.s32 0, %v418_v39 }
  0xe6   : > { %v1299_v26 = vld [vmem:[%s1988_s6 + $0x60] sm:$0xff]   ;;  %v1301_v29 = vld [vmem:[%s1988_s6 + $0x68] sm:$0xff]   ;;  %v1290_v32 = vld [vmem:[%s1970_s16 + $0x18] sm:$0xff]   ;;  %s414_s15 = scalar_lea.vmem [#allocation7], %s413_s14  ;;  %v423_v42 = vsub.s32 1, %v418_v39  ;;  %s859_s18 = sshll.u32 %s1999_s10, 4  ;;  %s2069_s18 = int_to_ptr.vmem [resolvable:$true] %s859_s18 }
  0xe7   : > { %v1287_v27 = vld [vmem:[%s1970_s16] sm:$0xff]   ;;  %v1288_v30 = vld [vmem:[%s1970_s16 + $0x8] sm:$0xff]   ;;  %v1289_v31 = vld [vmem:[%s1970_s16 + $0x10] sm:$0xff]   ;;  %s2197_s16 = sld [smem:[#allocation29_spill]]  ;;  %s846_s11 = scalar_lea.sflag [#allocation4], %s1966_s17 }
  0xe8   : > { %536 = vmatpush1.bf16.msra.mxu0 %v1271_v7  ;;  %1085 = vmatpush3.bf16.msra.mxu1 %v1294_v17  ;;  %v1300_v28 = vld [vmem:[%s1988_s6 + $0x20] sm:$0xff]   ;;  %v1302_v33 = vld [vmem:[%s1988_s6 + $0x28] sm:$0xff]   ;;  %v1303_v34 = vld [vmem:[%s1988_s6 + $0x70] sm:$0xff]   ;;  %s1453_s4 = scalar_lea.vmem %s2069_s18, 1024  ;;  %s1604_s8 = smov [#allocation11]  }
  0xe9   : > { %537 = vmatprep.subr.bf16.mxu0 %v1272_v8  ;;  %1086 = vmatprep.subr.bf16.mxu1 %v1295_v18  ;;  %v1304_v35 = vld [vmem:[%s1988_s6 + $0x30] sm:$0xff]   ;;  %v1305_v36 = vld [vmem:[%s1988_s6 + $0x78] sm:$0xff]   ;;  %v620_v38 = vld [vmem:[%s1999_s10] sm:$0xff]  ;;  %s1081_s27 = sshll.u32 %s2195_s24, 10  ;;  %p1454_p7 = scmp.ne.s32.totalorder %s2069_s18, %s1453_s4 }
  0xea   : > { %v1306_v37 = vld [vmem:[%s1988_s6 + $0x38] sm:$0xff]   ;;  %p2198_p8 = scmp.ne.s32.totalorder %s2196_s12, 0  ;;  %s1457_s21 = sshll.u32 %s1604_s8, 4  ;;  %s1458_s21 = int_to_ptr.vmem [resolvable:$false] %s1457_s21 }
  0xeb   : > { %v415_v41 = vld [vmem:[%s414_s15] ss:$2 sm:$0x3]  ;;  %s1459_s7 = scalar_lea.vmem %s1458_s21, 2048  ;;  %p1460_p3 = scmp.lt.s32.totalorder %s2069_s18, %s1458_s21 }
  0xec   : > { %538 = vmatpush1.bf16.msra.mxu0 %v1274_v9  ;;  %1087 = vmatpush3.bf16.msra.mxu1 %v1296_v21  ;;  %v420_v43 = vrot.slane %v415_v41, %v419_v40  ;;  %v424_v44 = vrot.slane %v415_v41, %v423_v42  ;;  %v621_v42 = vld [vmem:[%s1999_s10 + $0x8] sm:$0xff]  ;;  %p1455_p5 = pnand %p1454_p7, %p2198_p8  ;;  %p1461_p0 = scmp.lt.s32.totalorder %s1459_s7, %s1453_s4 }
  0xed   : > { %539 = vmatprep.subr.bf16.mxu0 %v1275_v10  ;;  %1088 = vmatprep.subr.bf16.mxu1 %v1297_v22  ;;  %s2067_s1 = scalar_lea.hbm %s2197_s16, %s1081_s27 }
  0xee   : > { %p1456_p13 = pneg %p1455_p5  ;;  %p1462_p1 = por %p1461_p0, %p1460_p3 }
  0xf0   : > { %540 = vmatpush1.bf16.msra.mxu0 %v1277_v11  ;;  %1089 = vmatpush3.bf16.msra.mxu1 %v1298_v25  ;;  %p1463_p10 = pnand %p1462_p1, %p1456_p13 }
  0xf1   : > { %541 = vmatprep.subr.bf16.mxu0 %v1278_v12  ;;  %1090 = vmatprep.subr.bf16.mxu1 %v1299_v26 }
  0xf4   : > { %542 = vmatpush1.bf16.msra.mxu0 %v1280_v15  ;;  %1091 = vmatpush3.bf16.msra.mxu1 %v1300_v28 }
  0xf5   : > { %543 = vmatprep.subr.bf16.mxu0 %v1281_v19  ;;  %1092 = vmatprep.subr.bf16.mxu1 %v1301_v29 }
  0xf8   : > { %544 = vmatpush1.bf16.msra.mxu0 %v1283_v20  ;;  %1093 = vmatpush3.bf16.msra.mxu1 %v1302_v33 }
  0xf9   : > { %545 = vmatprep.subr.bf16.mxu0 %v1284_v23  ;;  %1094 = vmatprep.subr.bf16.mxu1 %v1303_v34 }
  0xfc   : > { %546 = vmatpush1.bf16.msra.mxu0 %v1286_v24  ;;  %1095 = vmatpush3.bf16.msra.mxu1 %v1304_v35 }
  0xfd   : > { %1096 = vmatprep.subr.bf16.mxu1 %v1305_v36 }
  0xff   : > { %564 = vmatmul.mubr.bf16.vlgmr.msra.gmra.mrb[0].mxu0 %v1287_v27 }
 0x100   : > { %573 = vmatprep.mubr.bf16.mxu0 %v1603_v3  ;;  %1097 = vmatpush3.bf16.msra.mxu1 %v1306_v37 }
 0x107   : > { %574 = vmatmul.mubr.bf16.gmra.mrb[4].mxu0 %v1288_v30 }
 0x108   : > { %583 = vmatprep.mubr.bf16.mxu0 %v1603_v3 }
 0x10f   : > { %584 = vmatmul.mubr.bf16.gmra.mrb[8].mxu0 %v1289_v31 }
 0x110   : > { %593 = vmatprep.mubr.bf16.mxu0 %v1603_v3 }
 0x117   : > { %594 = vmatmul.mubr.bf16.gmra.mrb[12].mxu0 %v1290_v32 }
 0x1d2   : > { %v565_v45 = vpop.f32.mrb[0].mxu0 }
 0x1d3   : > { %v566_v46 = vadd.f32 %v565_v45, %v420_v43  ;;  %v567_v47 = vpop.f32.mrb[1].mxu0 }
 0x1d4   : > { %v568_v48 = vadd.f32 %v567_v47, %v424_v44  ;;  %v569_v49 = vpop.f32.mrb[2].mxu0 }
 0x1d5   : > { %v570_v50 = vadd.f32 %v569_v49, %v420_v43  ;;  %v571_v51 = vpop.f32.mrb[3].mxu0  ;;  %v604_v53 = vmax.f32 %v566_v46, 0.0 }
 0x1d6   : > { %v572_v52 = vadd.f32 %v571_v51, %v424_v44  ;;  %v605_v55 = vmax.f32 %v568_v48, 0.0  ;;  %v622_v48 = vld [vmem:[%s1999_s10 + $0x10] sm:$0xff] }
 0x1d7   : > { %v606_v54 = vmax.f32 %v570_v50, 0.0 }
 0x1d8   : > { %v607_v56 = vmax.f32 %v572_v52, 0.0  ;;  %v623_v52 = vld [vmem:[%s1999_s10 + $0x18] sm:$0xff] }
 0x1d9   : > { %v628_v57 = vpack.c.bf16 %v606_v54, %v604_v53 }
 0x1da   : > { %v575_v58 = vpop.f32.mrb[4].mxu0  ;;  %v629_v59 = vpack.c.bf16 %v607_v56, %v605_v55 }
 0x1db   : > { %v576_v60 = vadd.f32 %v575_v58, %v420_v43  ;;  %v577_v61 = vpop.f32.mrb[5].mxu0  ;;  %v624_v58 = vld [vmem:[%s1999_s10 + $0x20] sm:$0xff] }
 0x1dc   : > { %v578_v62 = vadd.f32 %v577_v61, %v424_v44  ;;  %v579_v63 = vpop.f32.mrb[6].mxu0  ;;  %796 = vmatprep.mubr.bf16.mxu1 %v629_v59 }
 0x1dd   : > { %v580_v0 = vadd.f32 %v579_v63, %v420_v43  ;;  %v581_v1 = vpop.f32.mrb[7].mxu0  ;;  %797 = vmatmul.mubr.bf16.vlgmr.msra.gmra.mrb[0].mxu1 %v628_v57  ;;  %v608_v3 = vmax.f32 %v576_v60, 0.0 }
 0x1de   : > { %v582_v2 = vadd.f32 %v581_v1, %v424_v44  ;;  %v609_v5 = vmax.f32 %v578_v62, 0.0  ;;  %v625_v62 = vld [vmem:[%s1999_s10 + $0x28] sm:$0xff] }
 0x1df   : > { %v610_v4 = vmax.f32 %v580_v0, 0.0 }
 0x1e0   : > { %v611_v6 = vmax.f32 %v582_v2, 0.0 }
 0x1e1   : > { %v630_v7 = vpack.c.bf16 %v610_v4, %v608_v3  ;;  %v626_v4 = vld [vmem:[%s1999_s10 + $0x30] sm:$0xff] }
 0x1e2   : > { %v631_v8 = vpack.c.bf16 %v611_v6, %v609_v5  ;;  %v585_v9 = vpop.f32.mrb[8].mxu0 }
 0x1e3   : > { %v586_v10 = vadd.f32 %v585_v9, %v420_v43  ;;  %v587_v11 = vpop.f32.mrb[9].mxu0 }
 0x1e4   : > { %v588_v12 = vadd.f32 %v587_v11, %v424_v44  ;;  %v589_v13 = vpop.f32.mrb[10].mxu0  ;;  %804 = vmatprep.mubr.bf16.mxu1 %v631_v8  ;;  %v627_v8 = vld [vmem:[%s1999_s10 + $0x38] sm:$0xff] }
 0x1e5   : > { %v590_v14 = vadd.f32 %v589_v13, %v420_v43  ;;  %v591_v15 = vpop.f32.mrb[11].mxu0  ;;  %805 = vmatmul.mubr.bf16.gmra.mrb[4].mxu1 %v630_v7  ;;  %v612_v17 = vmax.f32 %v586_v10, 0.0 }
 0x1e6   : > { %v592_v16 = vadd.f32 %v591_v15, %v424_v44  ;;  %v613_v19 = vmax.f32 %v588_v12, 0.0 }
 0x1e7   : > { %v614_v18 = vmax.f32 %v590_v14, 0.0 }
 0x1e8   : > { %v615_v20 = vmax.f32 %v592_v16, 0.0 }
 0x1e9   : > { %v632_v21 = vpack.c.bf16 %v614_v18, %v612_v17 }
 0x1ea   : > { %v633_v22 = vpack.c.bf16 %v615_v20, %v613_v19  ;;  %v595_v23 = vpop.f32.mrb[12].mxu0 }
 0x1eb   : > { %v596_v24 = vadd.f32 %v595_v23, %v420_v43  ;;  %v597_v25 = vpop.f32.mrb[13].mxu0 }
 0x1ec   : > { %v598_v26 = vadd.f32 %v597_v25, %v424_v44  ;;  %v599_v27 = vpop.f32.mrb[14].mxu0  ;;  %812 = vmatprep.mubr.bf16.mxu1 %v633_v22 }
 0x1ed   : > { %v600_v28 = vadd.f32 %v599_v27, %v420_v43  ;;  %v601_v29 = vpop.f32.mrb[15].mxu0  ;;  %813 = vmatmul.mubr.bf16.gmra.mrb[8].mxu1 %v632_v21  ;;  %v616_v31 = vmax.f32 %v596_v24, 0.0 }
 0x1ee   : > { %v602_v30 = vadd.f32 %v601_v29, %v424_v44  ;;  %v617_v33 = vmax.f32 %v598_v26, 0.0 }
 0x1ef   : > { %v618_v32 = vmax.f32 %v600_v28, 0.0 }
 0x1f0   : > { %v619_v34 = vmax.f32 %v602_v30, 0.0 }
 0x1f1   : > { %v634_v35 = vpack.c.bf16 %v618_v32, %v616_v31 }
 0x1f2   : > { %v635_v36 = vpack.c.bf16 %v619_v34, %v617_v33 }
 0x1f4   : > { %820 = vmatprep.mubr.bf16.mxu1 %v635_v36 }
 0x1f5   : > { %821 = vmatmul.mubr.bf16.gmra.mrb[12].mxu1 %v634_v35 }
 0x2b0   : > { %v1098_v37 = vpop.f32.mrb[0].mxu1 }
 0x2b1   : > { %v1099_v39 = vpop.f32.mrb[1].mxu1 }
 0x2b2   : > { %v1100_v40 = vadd.f32 %v1099_v39, %v1098_v37  ;;  %v1101_v41 = vpop.f32.mrb[2].mxu1 }
 0x2b3   : > { %v1102_v43 = vpop.f32.mrb[3].mxu1 }
 0x2b4   : > { %v829_v44 = vadd.f32 %v1100_v40, %v620_v38  ;;  %v1103_v45 = vadd.f32 %v1102_v43, %v1101_v41 }
 0x2b6   : > { %837 = vst [vmem:[%s1999_s10] sm:$0xff] %v829_v44  ;;  %v830_v46 = vadd.f32 %v1103_v45, %v621_v42 }
 0x2b8   : > { %838 = vst [vmem:[%s1999_s10 + $0x8] sm:$0xff] %v830_v46  ;;  %v1104_v47 = vpop.f32.mrb[4].mxu1 }
 0x2b9   : > { %v1105_v49 = vpop.f32.mrb[5].mxu1 }
 0x2ba   : > { %v1106_v50 = vadd.f32 %v1105_v49, %v1104_v47  ;;  %v1107_v51 = vpop.f32.mrb[6].mxu1 }
 0x2bb   : > { %v1108_v53 = vpop.f32.mrb[7].mxu1 }
 0x2bc   : > { %v831_v54 = vadd.f32 %v1106_v50, %v622_v48  ;;  %v1109_v55 = vadd.f32 %v1108_v53, %v1107_v51 }
 0x2be   : > { %839 = vst [vmem:[%s1999_s10 + $0x10] sm:$0xff] %v831_v54  ;;  %v832_v56 = vadd.f32 %v1109_v55, %v623_v52 }
 0x2c0   : > { %840 = vst [vmem:[%s1999_s10 + $0x18] sm:$0xff] %v832_v56  ;;  %v1110_v57 = vpop.f32.mrb[8].mxu1 }
 0x2c1   : > { %v1111_v59 = vpop.f32.mrb[9].mxu1 }
 0x2c2   : > { %v1112_v60 = vadd.f32 %v1111_v59, %v1110_v57  ;;  %v1113_v61 = vpop.f32.mrb[10].mxu1 }
 0x2c3   : > { %v1114_v63 = vpop.f32.mrb[11].mxu1 }
 0x2c4   : > { %v833_v0 = vadd.f32 %v1112_v60, %v624_v58  ;;  %v1115_v1 = vadd.f32 %v1114_v63, %v1113_v61 }
 0x2c6   : > { %841 = vst [vmem:[%s1999_s10 + $0x20] sm:$0xff] %v833_v0  ;;  %v834_v2 = vadd.f32 %v1115_v1, %v625_v62 }
 0x2c8   : > { %842 = vst [vmem:[%s1999_s10 + $0x28] sm:$0xff] %v834_v2  ;;  %v1116_v3 = vpop.f32.mrb[12].mxu1 }
 0x2c9   : > { %v1117_v5 = vpop.f32.mrb[13].mxu1 }
 0x2ca   : > { %v1118_v6 = vadd.f32 %v1117_v5, %v1116_v3  ;;  %v1119_v7 = vpop.f32.mrb[14].mxu1 }
 0x2cb   : > { %v1120_v9 = vpop.f32.mrb[15].mxu1 }
 0x2cc   : > { %v835_v10 = vadd.f32 %v1118_v6, %v626_v4  ;;  %v1121_v11 = vadd.f32 %v1120_v9, %v1119_v7 }
 0x2ce   : > { %843 = vst [vmem:[%s1999_s10 + $0x30] sm:$0xff] %v835_v10  ;;  %v836_v12 = vadd.f32 %v1121_v11, %v627_v8 }
 0x2d0   : > { %844 = vst [vmem:[%s1999_s10 + $0x38] sm:$0xff] %v836_v12 }
 0x2d1   : > { %1466 = shalt.err (!%p1463_p10)
}
 0x2d2   : > { %s1467_s6 = scalar_lea.hbm %s2067_s1, 1024  ;;  %s1471_s29 = scalar_lea.hbm %s2197_s16, 2048 }
 0x2d3   : > { %p1468_p11 = scmp.ne.s32.totalorder %s2067_s1, %s1467_s6  ;;  %p1472_p4 = scmp.lt.u32.totalorder %s2067_s1, %s2197_s16 }
 0x2d4   : > { %p1473_p12 = scmp.lt.u32.totalorder %s1471_s29, %s1467_s6  ;;  %p1475_p7 = scmp.lt.u32.totalorder %s1467_s6, %s2067_s1 }
 0x2d5   : > { %p1469_p2 = pnand %p1468_p11, %p2198_p8 }
 0x2d6   : > { %p1474_p9 = por %p1473_p12, %p1472_p4 }
 0x2d7   : > { %p1470_p6 = pneg %p1469_p2 }
 0x2d8   : > { %p1476_p5 = por %p1475_p7, %p1474_p9 }
 0x2da   : > { %p1477_p13 = pnand %p1476_p5, %p1470_p6 }
 0x2dc   : > { %1480 = shalt.err (!%p1477_p13)
}
 0x2dd   : > { %s1605_s14 = smov 128   ;;  %s1606_s15 = smov 8  }
 0x2de   : > { %1136 = dma.vmem_to_hbm [thread:$0]  (%p2198_p8), %s2069_s18, 1024, %s2067_s1, %s846_s11, %s1605_s14, %s1605_s14, %s1606_s15  }
 0x2df PF: > { %s2199_s24 = sld [smem:[#allocation18_spill]]  ;;  %s2200_s27 = sld [smem:[#allocation21_spill]] }
 0x2e0   : > { %p1164_p3 = scmp.ge.s32.totalorder %s1591_s28, 2 }
 0x2e5   : > { %s874_s30 = sand.u32 1, %s2199_s24   ;;  %p2201_p0 = scmp.ne.s32.totalorder %s2200_s27, 0 }
 0x2e6   : > { %s875_s0 = scalar_lea.sflag [#allocation4], %s874_s30 }
 0x2e7   : > { %p1156_p1 = pnand %p1164_p3, %p2201_p0 }
 0x2e9   : > { %1546 = dma.done.wait (!%p1156_p1), %s875_s0, 1024  }
 0x2ea   : > { %1548 = vsyncadd (!%p1156_p1), %s875_s0, 4294966272  ;;  %s27_s28 = sadd.s32 1, %s1591_s28   ;;  %s2202_s25 = sld [smem:[#allocation20_spill]] }
 0x2eb   : > { %p24_p10 = scmp.ge.s32.totalorder %s27_s28, 6   ;;  %s2203_s17 = sld [smem:[#allocation22_spill]] }
 0x2ec   : > { %s2204_s27 = sld [smem:[#allocation24_spill]]  ;;  %s2205_s18 = smov %s1555_s19 }
 0x2ed   : > { %s2206_s19 = smov %s1559_s20  ;;  %s2207_s20 = smov %s1818_s13 }
 0x2ee   : > { %s2208_s21 = smov %s1567_s22  ;;  %s2209_s22 = smov %s1571_s23 }
 0x2ef   : > { %s2210_s23 = smov %s1824_s2  ;;  %s2211_s24 = smov %s1583_s26 }
 0x2f0   :  { %26 = sbr.rel (!%p24_p10) target bundleno = 19 (0x13), region = 124 }
 0x2f1   : > { %s2212_s26 = smov %s2203_s17 }
 0x2f7   :  { %880 = vsyncpa [#allocation3], 1 }
 0x2f8   :  { %882 = vsyncpa [#allocation3 + $0x1], 1 }
 0x2f9   :  { %883 = vsyncpa [#allocation6], 1 }
 0x2fa   :  { %885 = vsyncpa [#allocation6 + $0x1], 1 }
 0x2fb   :  { %886 = vsyncpa [#allocation9], 1 }
 0x2fc   :  { %888 = vsyncpa [#allocation9 + $0x1], 1 }
 0x2fd   :  { %889 = vsyncpa [#allocation4], 1 }
 0x2fe   :  { %891 = vsyncpa [#allocation4 + $0x1], 1 }

</bundles_post_ra>
